<compile_context>
chip_gen: v5e
topology: v5e:2x2
jax: 0.10.0
libtpu: 0.0.40
codegen_flags: <defaults>
</compile_context>

<pallas_src>
from functools import partial

import jax
import jax.numpy as jnp
from jax.experimental import pallas as pl
from jax.experimental.pallas import tpu as pltpu


def _round_up(x, m):
    return (x + m - 1) // m * m


def _lane_pad(n):
    # v6e/v7x MXUs are 256x256: pad dims >= 192 to multiples of 256, else 128.
    return 256 if n >= 192 else 128


def _vmem_capacity_bytes():
    try:
        cap = getattr(pltpu.get_tpu_info(), "vmem_capacity_bytes", None)
        if cap:
            return int(cap)
    except Exception:
        pass
    return 64 << 20        # conservative fallback: v7x per-TensorCore VMEM


def _vmem_limit(working_set_bytes):
    ceiling = (_vmem_capacity_bytes() * 3) // 4
    return int(min(max(2 * working_set_bytes, 32 << 20), ceiling))


# --------------------------- kernel 1: conv + stats --------------------------
def _conv_stats_kernel(p_ref, w_ref, conv_ref, stats_ref, acc_ref):
    """Per (m_tile, k_tile): MXU conv accumulation (f32).  On the last k tile,
    spill the bf16 conv tile and this tile's per-channel sum / sum-of-squares
    (rows 0 / 1 of an (8, OCp) slab so the store stays (8,128)-aligned)."""
    k = pl.program_id(1)

    @pl.when(k == 0)
    def _init():
        acc_ref[...] = jnp.zeros_like(acc_ref)

    acc_ref[...] += jnp.dot(p_ref[...], w_ref[...],
                            preferred_element_type=jnp.float32)

    @pl.when(k == pl.num_programs(1) - 1)
    def _finalize():
        conv = acc_ref[...]
        conv_ref[...] = conv.astype(conv_ref.dtype)
        ocp = conv.shape[1]
        s = jnp.broadcast_to(jnp.sum(conv, axis=0, keepdims=True), (8, ocp))
        q = jnp.broadcast_to(jnp.sum(conv * conv, axis=0, keepdims=True),
                             (8, ocp))
        row = jax.lax.broadcasted_iota(jnp.int32, (8, ocp), 0)
        stats_ref[0] = jnp.where(row == 0, s, jnp.where(row == 1, q, 0.0))


# --------------------------- kernel 2: BN + ReLU ------------------------------
def _bn_relu_kernel(conv_ref, scale_ref, shift_ref, o_ref):
    y = conv_ref[...].astype(jnp.float32) * scale_ref[...] + shift_ref[...]
    o_ref[...] = jnp.maximum(y, 0.0).astype(o_ref.dtype)


# --------------------------- wrapper ------------------------------------------
def _im2col(x, KH, KW, stride, padding):
    # TODO(synk): replace the materialized im2col with an implicit-GEMM kernel
    # (loop over KH*KW shifted NHWC slabs inside kernel 1) to cut HBM input
    # traffic by ~KH*KW at realistic channel counts.
    N, C, H, W = x.shape
    xp = jnp.pad(x, ((0, 0), (0, 0), (padding, padding), (padding, padding)))
    OH = (H + 2 * padding - KH) // stride + 1
    OW = (W + 2 * padding - KW) // stride + 1
    cols = []
    for kh in range(KH):
        for kw in range(KW):
            cols.append(xp[:, :, kh:kh + stride * OH:stride,
                           kw:kw + stride * OW:stride])
    cols = jnp.stack(cols, axis=2)                 # (N, C, KH*KW, OH, OW)
    cols = cols.reshape(N, C * KH * KW, OH, OW)    # feature order: c, kh, kw
    cols = cols.transpose(0, 2, 3, 1).reshape(N * OH * OW, C * KH * KW)
    return cols, OH, OW


def conv_bn_relu(x, weight, bias, gamma, beta, *, stride=1, padding=0,
                 eps=1e-5, tm=512, tk=2048):
    """x: (N,C,H,W) f32; weight: (OC,C,KH,KW); bias/gamma/beta: (OC,) -> NCHW f32.

    `bias` is accepted for nn.Conv2d(bias=True) parity but never added: with
    training-mode (batch-statistic) BatchNorm2d a per-channel conv bias is
    cancelled exactly by the batch-mean subtraction.  If this kernel is ever
    reused with eval-mode running stats the bias must be re-added.
    """
    del bias
    N, C, H, W = x.shape
    OC, _, KH, KW = weight.shape

    # im2col patches built directly in bf16 (no f32 (Mp, Kp) round trip).
    patches, OH, OW = _im2col(x.astype(jnp.bfloat16), KH, KW, stride, padding)
    M, K = patches.shape

    OCp = _round_up(OC, _lane_pad(OC))
    Kp = _round_up(K, _lane_pad(K))
    if Kp > tk:                       # K-tiling for large-channel weights
        TK = tk
        Kp = _round_up(Kp, TK)
    else:
        TK = Kp
    n_kt = Kp // TK

    TM = tm if M >= tm else _round_up(M, 16)   # bf16 sublane packing
    Mp = _round_up(M, TM)
    n_mt = Mp // TM

    patches_p = jnp.zeros((Mp, Kp), jnp.bfloat16).at[:M, :K].set(patches)
    w2d = (jnp.zeros((Kp, OCp), jnp.bfloat16)
           .at[:K, :OC].set(weight.reshape(OC, K).T.astype(jnp.bfloat16)))

    # ---- kernel 1: conv tiles + per-tile channel stats ----------------------
    # TODO(synk): pipeline_mode=pl.Buffered(1) on the weight spec (constant
    # block index across m tiles) would save one weight buffer on v7x.
    vmem1 = (2 * TM * TK * 2 + 2 * TK * OCp * 2
             + 2 * TM * OCp * 2 + 2 * 8 * OCp * 4 + TM * OCp * 4)
    cost1 = pl.CostEstimate(
        flops=2 * Mp * Kp * OCp, transcendentals=0,
        bytes_accessed=(Mp * Kp * 2 + n_mt * Kp * OCp * 2
                        + Mp * OCp * 2 + n_mt * 8 * OCp * 4))
    conv, stats = pl.pallas_call(
        _conv_stats_kernel,
        out_shape=(jax.ShapeDtypeStruct((Mp, OCp), jnp.bfloat16),
                   jax.ShapeDtypeStruct((n_mt, 8, OCp), jnp.float32)),
        grid_spec=pltpu.PrefetchScalarGridSpec(
            num_scalar_prefetch=0,
            grid=(n_mt, n_kt),                       # reduction axis (k) last
            in_specs=[
                pl.BlockSpec((TM, TK), lambda i, k: (i, k)),
                pl.BlockSpec((TK, OCp), lambda i, k: (k, 0)),
            ],
            out_specs=(
                pl.BlockSpec((TM, OCp), lambda i, k: (i, 0)),
                pl.BlockSpec((1, 8, OCp), lambda i, k: (i, 0, 0)),
            ),
            scratch_shapes=[pltpu.VMEM((TM, OCp), jnp.float32)],
        ),
        compiler_params=pltpu.CompilerParams(
            dimension_semantics=("parallel", "arbitrary"),
            vmem_limit_bytes=_vmem_limit(vmem1)),
        cost_estimate=cost1,
    )(patches_p, w2d)

    # ---- fold BN (batch statistics) into per-channel scale / shift ----------
    # Streaming E[x^2] - E[x]^2 in f32 (padded rows/channels contribute exactly
    # zero since no bias was added); clamp tiny negative variances.
    # TODO(synk): running_mean / running_var momentum updates are stateful
    # training bookkeeping, not part of the forward output; omitted.
    tot = jnp.sum(stats[:, 0, :], axis=0)
    tot_sq = jnp.sum(stats[:, 1, :], axis=0)
    inv_m = 1.0 / float(M)
    mean = tot * inv_m
    var = jnp.maximum(tot_sq * inv_m - mean * mean, 0.0)
    inv_std = jax.lax.rsqrt(var + eps)
    g = jnp.zeros((OCp,), jnp.float32).at[:OC].set(gamma.astype(jnp.float32))
    b = jnp.zeros((OCp,), jnp.float32).at[:OC].set(beta.astype(jnp.float32))
    scale = (g * inv_std).reshape(1, OCp)
    shift = (b - mean * g * inv_std).reshape(1, OCp)

    # ---- kernel 2: y = conv * scale + shift, ReLU ----------------------------
    vmem2 = 2 * TM * OCp * 2 * 2 + 4 * OCp * 4
    cost2 = pl.CostEstimate(
        flops=2 * Mp * OCp, transcendentals=0,
        bytes_accessed=2 * Mp * OCp * 2 + 2 * OCp * 4)
    out = pl.pallas_call(
        _bn_relu_kernel,
        out_shape=jax.ShapeDtypeStruct((Mp, OCp), jnp.bfloat16),
        grid_spec=pltpu.PrefetchScalarGridSpec(
            num_scalar_prefetch=0,
            grid=(n_mt,),
            in_specs=[
                pl.BlockSpec((TM, OCp), lambda i: (i, 0)),
                pl.BlockSpec((1, OCp), lambda i: (0, 0)),
                pl.BlockSpec((1, OCp), lambda i: (0, 0)),
            ],
            out_specs=pl.BlockSpec((TM, OCp), lambda i: (i, 0)),
        ),
        compiler_params=pltpu.CompilerParams(
            dimension_semantics=("parallel",),
            vmem_limit_bytes=_vmem_limit(vmem2)),
        cost_estimate=cost2,
    )(conv, scale, shift)

    # Crop padding, (M,OC) -> (N,OH,OW,OC) -> NCHW, cast back to f32 (module
    # parity).  TODO(synk): consumers that accept NHWC/bf16 should skip this.
    out = out[:M, :OC].reshape(N, OH, OW, OC).transpose(0, 3, 1, 2)
    return out.astype(jnp.float32)


# --------------------------- reference & test ---------------------------------
def _reference(x, weight, bias, gamma, beta, *, stride, padding, eps):
    conv = jax.lax.conv_general_dilated(
        x, weight, window_strides=(stride, stride),
        padding=[(padding, padding), (padding, padding)],
        dimension_numbers=("NCHW", "OIHW", "NCHW"),
    ) + bias.reshape(1, -1, 1, 1)
    mean = jnp.mean(conv, axis=(0, 2, 3), keepdims=True)
    var = jnp.mean(jnp.square(conv - mean), axis=(0, 2, 3), keepdims=True)
    y = (conv - mean) * jax.lax.rsqrt(var + eps)
    y = y * gamma.reshape(1, -1, 1, 1) + beta.reshape(1, -1, 1, 1)
    return jnp.maximum(y, 0.0)


if __name__ == "__main__":
    # ConvBnRelu(4, 8, kernel_size=3, stride=1, padding=1) on x (2, 4, 16, 16).
    N, C, H, W = 2, 4, 16, 16
    OC, KH, KW = 8, 3, 3
    stride, padding, eps = 1, 1, 1e-5

    key = jax.random.PRNGKey(0)
    kx, kw_, kb = jax.random.split(key, 3)
    x = jax.random.normal(kx, (N, C, H, W), dtype=jnp.float32)
    weight = jax.random.normal(kw_, (OC, C, KH, KW), dtype=jnp.float32) * 0.1
    bias = jax.random.normal(kb, (OC,), dtype=jnp.float32) * 0.1
    gamma = jnp.ones((OC,), dtype=jnp.float32)   # BatchNorm2d affine init
    beta = jnp.zeros((OC,), dtype=jnp.float32)

    fn = jax.jit(partial(conv_bn_relu, stride=stride, padding=padding, eps=eps))
    out = jax.block_until_ready(fn(x, weight, bias, gamma, beta))

    ref = _reference(x, weight, bias, gamma, beta,
                     stride=stride, padding=padding, eps=eps)
    assert out.shape == (N, OC, H, W)
    max_err = float(jnp.max(jnp.abs(out - ref)))
    assert jnp.allclose(out, ref, rtol=5e-2, atol=5e-2), max_err

    print("KERNEL_OK")
</pallas_src>

<mosaic_0001>
module attributes {stable_mosaic.version = 11 : i64} {
  func.func @_bn_relu_kernel(%arg0: i32, %arg1: memref<512x128xbf16, #tpu.memory_space<vmem>>, %arg2: memref<1x128xf32, #tpu.memory_space<vmem>>, %arg3: memref<1x128xf32, #tpu.memory_space<vmem>>, %arg4: memref<512x128xbf16, #tpu.memory_space<vmem>>) attributes {dimension_semantics = [#tpu.dimension_semantics<parallel>], iteration_bounds = array<i64: 1>, scalar_prefetch = 0 : i64, scratch_operands = 0 : i64, tpu.core_type = #tpu.core_type<tc>, window_params = [{transform_indices = @transform_0, window_bounds = array<i64: 512, 128>}, {pipeline_mode = #tpu.pipeline_mode<synchronous>, transform_indices = @transform_1, window_bounds = array<i64: 1, 128>}, {pipeline_mode = #tpu.pipeline_mode<synchronous>, transform_indices = @transform_2, window_bounds = array<i64: 1, 128>}, {transform_indices = @transform_3, window_bounds = array<i64: 512, 128>}]} {
    %c0 = arith.constant 0 : index
    %c0_0 = arith.constant 0 : index
    %0 = vector.load %arg1[%c0, %c0_0] : memref<512x128xbf16, #tpu.memory_space<vmem>>, vector<512x128xbf16>
    %1 = arith.extf %0 : vector<512x128xbf16> to vector<512x128xf32>
    %c0_1 = arith.constant 0 : index
    %c0_2 = arith.constant 0 : index
    %2 = vector.load %arg2[%c0_1, %c0_2] : memref<1x128xf32, #tpu.memory_space<vmem>>, vector<1x128xf32>
    %3 = vector.broadcast %2 : vector<1x128xf32> to vector<512x128xf32>
    %4 = arith.mulf %1, %3 : vector<512x128xf32>
    %c0_3 = arith.constant 0 : index
    %c0_4 = arith.constant 0 : index
    %5 = vector.load %arg3[%c0_3, %c0_4] : memref<1x128xf32, #tpu.memory_space<vmem>>, vector<1x128xf32>
    %6 = vector.broadcast %5 : vector<1x128xf32> to vector<512x128xf32>
    %7 = arith.addf %4, %6 : vector<512x128xf32>
    %cst = arith.constant 0.000000e+00 : f32
    %8 = vector.broadcast %cst : f32 to vector<512x128xf32>
    %9 = arith.maximumf %7, %8 : vector<512x128xf32>
    %10 = arith.truncf %9 : vector<512x128xf32> to vector<512x128xbf16>
    %c0_5 = arith.constant 0 : index
    %c0_6 = arith.constant 0 : index
    %11 = vector.load %arg4[%c0_5, %c0_6] : memref<512x128xbf16, #tpu.memory_space<vmem>>, vector<512x128xbf16>
    tpu.vector_store %arg4[%c0_5, %c0_6], %10 {strides = array<i32>} : memref<512x128xbf16, #tpu.memory_space<vmem>>, vector<512x128xbf16>,
    return
  }
  func.func @transform_0(%arg0: i32) -> (i32, i32) {
    %c0_i32 = arith.constant 0 : i32
    %c0_i32_0 = arith.constant 0 : i32
    return %arg0, %c0_i32 : i32, i32
  }
  func.func @transform_1(%arg0: i32) -> (i32, i32) {
    %c0_i32 = arith.constant 0 : i32
    %c0_i32_0 = arith.constant 0 : i32
    %c0_i32_1 = arith.constant 0 : i32
    return %c0_i32, %c0_i32_0 : i32, i32
  }
  func.func @transform_2(%arg0: i32) -> (i32, i32) {
    %c0_i32 = arith.constant 0 : i32
    %c0_i32_0 = arith.constant 0 : i32
    %c0_i32_1 = arith.constant 0 : i32
    return %c0_i32, %c0_i32_0 : i32, i32
  }
  func.func @transform_3(%arg0: i32) -> (i32, i32) {
    %c0_i32 = arith.constant 0 : i32
    %c0_i32_0 = arith.constant 0 : i32
    return %arg0, %c0_i32 : i32, i32
  }
}

module attributes {stable_mosaic.version = 11 : i64} {
  func.func @_conv_stats_kernel(%arg0: i32, %arg1: i32, %arg2: memref<512x128xbf16, #tpu.memory_space<vmem>>, %arg3: memref<128x128xbf16, #tpu.memory_space<vmem>>, %arg4: memref<512x128xbf16, #tpu.memory_space<vmem>>, %arg5: memref<1x8x128xf32, #tpu.memory_space<vmem>>, %arg6: memref<512x128xf32, #tpu.memory_space<vmem>>) attributes {dimension_semantics = [#tpu.dimension_semantics<parallel>, #tpu.dimension_semantics<arbitrary>], iteration_bounds = array<i64: 1, 1>, scalar_prefetch = 0 : i64, scratch_operands = 1 : i64, tpu.core_type = #tpu.core_type<tc>, window_params = [{transform_indices = @transform_0, window_bounds = array<i64: 512, 128>}, {transform_indices = @transform_1, window_bounds = array<i64: 128, 128>}, {transform_indices = @transform_2, window_bounds = array<i64: 512, 128>}, {transform_indices = @transform_3, window_bounds = array<i64: 1, 8, 128>}]} {
    %c0_i32 = arith.constant 0 : i32
    %0 = arith.cmpi eq, %arg1, %c0_i32 : i32
    %1 = arith.extui %0 : i1 to i32
    %c0_i32_0 = arith.constant 0 : i32
    %2 = arith.cmpi ne, %1, %c0_i32_0 : i32
    scf.if %2 {
      %cst_10 = arith.constant 0.000000e+00 : f32
      %12 = vector.broadcast %cst_10 : f32 to vector<512x128xf32>
      %c0_11 = arith.constant 0 : index
      %c0_12 = arith.constant 0 : index
      %13 = vector.load %arg6[%c0_11, %c0_12] : memref<512x128xf32, #tpu.memory_space<vmem>>, vector<512x128xf32>
      tpu.vector_store %arg6[%c0_11, %c0_12], %12 {strides = array<i32>} : memref<512x128xf32, #tpu.memory_space<vmem>>, vector<512x128xf32>,
    } else {
    }
    %c0 = arith.constant 0 : index
    %c0_1 = arith.constant 0 : index
    %3 = vector.load %arg6[%c0, %c0_1] : memref<512x128xf32, #tpu.memory_space<vmem>>, vector<512x128xf32>
    %c0_2 = arith.constant 0 : index
    %c0_3 = arith.constant 0 : index
    %4 = vector.load %arg2[%c0_2, %c0_3] : memref<512x128xbf16, #tpu.memory_space<vmem>>, vector<512x128xbf16>
    %c0_4 = arith.constant 0 : index
    %c0_5 = arith.constant 0 : index
    %5 = vector.load %arg3[%c0_4, %c0_5] : memref<128x128xbf16, #tpu.memory_space<vmem>>, vector<128x128xbf16>
    %cst = arith.constant dense<0.000000e+00> : vector<512x128xf32>
    %6 = tpu.matmul %4, %5, %cst {dimension_numbers = #tpu.dot_dimension_numbers<[1], [0], [0], [1], [0, 0, 1, 1], [], []>} : vector<512x128xbf16>, vector<128x128xbf16>, vector<512x128xf32> -> vector<512x128xf32>
    %7 = arith.addf %3, %6 : vector<512x128xf32>
    %c0_6 = arith.constant 0 : index
    %c0_7 = arith.constant 0 : index
    %8 = vector.load %arg6[%c0_6, %c0_7] : memref<512x128xf32, #tpu.memory_space<vmem>>, vector<512x128xf32>
    tpu.vector_store %arg6[%c0_6, %c0_7], %7 {strides = array<i32>} : memref<512x128xf32, #tpu.memory_space<vmem>>, vector<512x128xf32>,
    %c0_i32_8 = arith.constant 0 : i32
    %9 = arith.cmpi eq, %arg1, %c0_i32_8 : i32
    %10 = arith.extui %9 : i1 to i32
    %c0_i32_9 = arith.constant 0 : i32
    %11 = arith.cmpi ne, %10, %c0_i32_9 : i32
    scf.if %11 {
      %c0_10 = arith.constant 0 : index
      %c0_11 = arith.constant 0 : index
      %12 = vector.load %arg6[%c0_10, %c0_11] : memref<512x128xf32, #tpu.memory_space<vmem>>, vector<512x128xf32>
      %13 = arith.truncf %12 : vector<512x128xf32> to vector<512x128xbf16>
      %c0_12 = arith.constant 0 : index
      %c0_13 = arith.constant 0 : index
      %14 = vector.load %arg4[%c0_12, %c0_13] : memref<512x128xbf16, #tpu.memory_space<vmem>>, vector<512x128xbf16>
      tpu.vector_store %arg4[%c0_12, %c0_13], %13 {strides = array<i32>} : memref<512x128xbf16, #tpu.memory_space<vmem>>, vector<512x128xbf16>,
      %cst_14 = arith.constant dense<0.000000e+00> : vector<128xf32>
      %15 = vector.multi_reduction <add>, %12, %cst_14 [0] : vector<512x128xf32> to vector<128xf32>
      %16 = vector.shape_cast %15 : vector<128xf32> to vector<1x128xf32>
      %17 = vector.shape_cast %16 : vector<1x128xf32> to vector<1x128xf32>
      %18 = vector.broadcast %17 : vector<1x128xf32> to vector<8x128xf32>
      %19 = arith.mulf %12, %12 : vector<512x128xf32>
      %cst_15 = arith.constant dense<0.000000e+00> : vector<128xf32>
      %20 = vector.multi_reduction <add>, %19, %cst_15 [0] : vector<512x128xf32> to vector<128xf32>
      %21 = vector.shape_cast %20 : vector<128xf32> to vector<1x128xf32>
      %22 = vector.shape_cast %21 : vector<1x128xf32> to vector<1x128xf32>
      %23 = vector.broadcast %22 : vector<1x128xf32> to vector<8x128xf32>
      %24 = tpu.iota {dimensions = array<i32: 0>} : vector<8x128xi32>
      %c0_i32_16 = arith.constant 0 : i32
      %25 = vector.broadcast %c0_i32_16 : i32 to vector<8x128xi32>
      %26 = arith.cmpi eq, %24, %25 : vector<8x128xi32>
      %c1_i32 = arith.constant 1 : i32
      %27 = vector.broadcast %c1_i32 : i32 to vector<8x128xi32>
      %28 = arith.cmpi eq, %24, %27 : vector<8x128xi32>
      %cst_17 = arith.constant 0.000000e+00 : f32
      %29 = vector.broadcast %cst_17 : f32 to vector<8x128xf32>
      %30 = arith.select %28, %23, %29 : vector<8x128xi1>, vector<8x128xf32>
      %31 = arith.select %26, %18, %30 : vector<8x128xi1>, vector<8x128xf32>
      %c0_18 = arith.constant 0 : index
      %c0_19 = arith.constant 0 : index
      %c0_20 = arith.constant 0 : index
      %32 = vector.load %arg5[%c0_18, %c0_19, %c0_20] : memref<1x8x128xf32, #tpu.memory_space<vmem>>, vector<1x8x128xf32>
      %33 = vector.shape_cast %32 : vector<1x8x128xf32> to vector<8x128xf32>
      %34 = vector.shape_cast %31 : vector<8x128xf32> to vector<1x8x128xf32>
      tpu.vector_store %arg5[%c0_18, %c0_19, %c0_20], %34 {strides = array<i32>} : memref<1x8x128xf32, #tpu.memory_space<vmem>>, vector<1x8x128xf32>,
    } else {
    }
    return
  }
  func.func @transform_0(%arg0: i32, %arg1: i32) -> (i32, i32) {
    %c0_i32 = arith.constant 0 : i32
    return %arg0, %arg1 : i32, i32
  }
  func.func @transform_1(%arg0: i32, %arg1: i32) -> (i32, i32) {
    %c0_i32 = arith.constant 0 : i32
    %c0_i32_0 = arith.constant 0 : i32
    return %arg1, %c0_i32 : i32, i32
  }
  func.func @transform_2(%arg0: i32, %arg1: i32) -> (i32, i32) {
    %c0_i32 = arith.constant 0 : i32
    %c0_i32_0 = arith.constant 0 : i32
    return %arg0, %c0_i32 : i32, i32
  }
  func.func @transform_3(%arg0: i32, %arg1: i32) -> (i32, i32, i32) {
    %c0_i32 = arith.constant 0 : i32
    %c0_i32_0 = arith.constant 0 : i32
    %c0_i32_1 = arith.constant 0 : i32
    return %arg0, %c0_i32, %c0_i32_0 : i32, i32, i32
  }
}

</mosaic_0001>

<bundles_post_ra>
// kernel: conv_bn_relu.3
= control target key start
LH: loop header
LB: loop body
LE: loop exit
PB: predicated region body
PF: predicated region fallthrough
CT: control target
= control target key end

     0   :  { %s1176_s0 = inlined_call_operand.vmem [shape: bf16[512,128], index: 0, kind: input, shape index: {}]   ;;  %s1177_s1 = inlined_call_operand.vmem [shape: f32[1,128], index: 1, kind: input, shape index: {}]   ;;  %s1178_s2 = inlined_call_operand.vmem [shape: f32[1,128], index: 2, kind: input, shape index: {}]   ;;  %s1179_s3 = inlined_call_operand.vmem [shape: bf16[512,128], index: 3, kind: output, shape index: {}]  }
   0x1   :  { %v475_v0 = vld [vmem:[%s1176_s0] sm:$0xff]   ;;  %v762_v5 = vld [vmem:[%s1176_s0 + $0x8] sm:$0xff]   ;;  %v763_v8 = vld [vmem:[%s1176_s0 + $0x10] sm:$0xff]  }
   0x2   :  { %v852_v1 = vld [vmem:[%s1177_s1] ss:$0 sm:$0xff]  ;;  %v476_v2 = vunpack.c.l.bf16 %v475_v0  ;;  %v477_v3 = vunpack.c.h.bf16 %v475_v0  ;;  %v480_v6 = vunpack.c.l.bf16 %v762_v5  ;;  %v481_v7 = vunpack.c.h.bf16 %v762_v5  ;;  %v764_v9 = vld [vmem:[%s1176_s0 + $0x18] sm:$0xff]   ;;  %v766_v35 = vld [vmem:[%s1176_s0 + $0x28] sm:$0xff]  }
   0x3   :  { %v857_v4 = vld [vmem:[%s1178_s2] ss:$0 sm:$0xff]  ;;  %v484_v12 = vunpack.c.l.bf16 %v763_v8  ;;  %v485_v13 = vunpack.c.h.bf16 %v763_v8  ;;  %v488_v16 = vunpack.c.l.bf16 %v764_v9  ;;  %v489_v17 = vunpack.c.h.bf16 %v764_v9  ;;  %v767_v40 = vld [vmem:[%s1176_s0 + $0x30] sm:$0xff]   ;;  %v768_v45 = vld [vmem:[%s1176_s0 + $0x38] sm:$0xff]  }
   0x4   :  { %v146_v10 = vmul.f32 %v852_v1, %v476_v2  ;;  %v147_v11 = vmul.f32 %v852_v1, %v477_v3  ;;  %v148_v14 = vmul.f32 %v852_v1, %v480_v6  ;;  %v149_v15 = vmul.f32 %v852_v1, %v481_v7  ;;  %v765_v26 = vld [vmem:[%s1176_s0 + $0x20] sm:$0xff]  }
   0x5   :  { %v150_v20 = vmul.f32 %v852_v1, %v484_v12  ;;  %v151_v21 = vmul.f32 %v852_v1, %v485_v13  ;;  %v152_v24 = vmul.f32 %v852_v1, %v488_v16  ;;  %v153_v25 = vmul.f32 %v852_v1, %v489_v17  ;;  %v769_v62 = vld [vmem:[%s1176_s0 + $0x40] sm:$0xff]   ;;  %v770_v13 = vld [vmem:[%s1176_s0 + $0x48] sm:$0xff]  }
   0x6   :  { %v214_v18 = vadd.f32 %v857_v4, %v146_v10  ;;  %v215_v19 = vadd.f32 %v857_v4, %v147_v11  ;;  %v216_v22 = vadd.f32 %v857_v4, %v148_v14  ;;  %v217_v23 = vadd.f32 %v857_v4, %v149_v15 }
   0x7   :  { %v218_v29 = vadd.f32 %v857_v4, %v150_v20  ;;  %v219_v30 = vadd.f32 %v857_v4, %v151_v21  ;;  %v220_v33 = vadd.f32 %v857_v4, %v152_v24  ;;  %v221_v34 = vadd.f32 %v857_v4, %v153_v25 }
   0x8   :  { %v278_v27 = vmax.f32 %v214_v18, 0.0  ;;  %v279_v28 = vmax.f32 %v215_v19, 0.0  ;;  %v280_v31 = vmax.f32 %v216_v22, 0.0  ;;  %v281_v32 = vmax.f32 %v217_v23, 0.0  ;;  %v771_v18 = vld [vmem:[%s1176_s0 + $0x50] sm:$0xff]   ;;  %v772_v23 = vld [vmem:[%s1176_s0 + $0x58] sm:$0xff]  }
   0x9   :  { %v282_v37 = vmax.f32 %v218_v29, 0.0  ;;  %v283_v38 = vmax.f32 %v219_v30, 0.0  ;;  %v492_v39 = vunpack.c.l.bf16 %v765_v26  ;;  %v284_v42 = vmax.f32 %v220_v33, 0.0 }
   0xa   :  { %v605_v36 = vpack.c.bf16 %v279_v28, %v278_v27  ;;  %v610_v41 = vpack.c.bf16 %v281_v32, %v280_v31  ;;  %v285_v43 = vmax.f32 %v221_v34, 0.0  ;;  %v493_v44 = vunpack.c.h.bf16 %v765_v26 }
   0xb   :  { %v615_v46 = vpack.c.bf16 %v283_v38, %v282_v37  ;;  %v154_v47 = vmul.f32 %v852_v1, %v492_v39  ;;  %v496_v48 = vunpack.c.l.bf16 %v766_v35  ;;  %v497_v49 = vunpack.c.h.bf16 %v766_v35 }
   0xc   :  { %606 = vst [vmem:[%s1179_s3] sm:$0xff] %v605_v36   ;;  %v620_v50 = vpack.c.bf16 %v285_v43, %v284_v42  ;;  %v155_v51 = vmul.f32 %v852_v1, %v493_v44  ;;  %v500_v52 = vunpack.c.l.bf16 %v767_v40  ;;  %v501_v53 = vunpack.c.h.bf16 %v767_v40  ;;  %v773_v36 = vld [vmem:[%s1176_s0 + $0x60] sm:$0xff]  }
   0xd   :  { %793 = vst [vmem:[%s1179_s3 + $0x8] sm:$0xff] %v610_v41   ;;  %v222_v54 = vadd.f32 %v857_v4, %v154_v47  ;;  %v156_v55 = vmul.f32 %v852_v1, %v496_v48  ;;  %v157_v56 = vmul.f32 %v852_v1, %v497_v49  ;;  %v504_v57 = vunpack.c.l.bf16 %v768_v45 }
   0xe   :  { %794 = vst [vmem:[%s1179_s3 + $0x10] sm:$0xff] %v615_v46   ;;  %v223_v58 = vadd.f32 %v857_v4, %v155_v51  ;;  %v158_v59 = vmul.f32 %v852_v1, %v500_v52  ;;  %v159_v60 = vmul.f32 %v852_v1, %v501_v53  ;;  %v505_v61 = vunpack.c.h.bf16 %v768_v45  ;;  %v774_v53 = vld [vmem:[%s1176_s0 + $0x68] sm:$0xff]  }
   0xf   :  { %795 = vst [vmem:[%s1179_s3 + $0x18] sm:$0xff] %v620_v50   ;;  %v286_v63 = vmax.f32 %v222_v54, 0.0  ;;  %v224_v0 = vadd.f32 %v857_v4, %v156_v55  ;;  %v225_v2 = vadd.f32 %v857_v4, %v157_v56  ;;  %v160_v3 = vmul.f32 %v852_v1, %v504_v57 }
  0x10   :  { %v287_v5 = vmax.f32 %v223_v58, 0.0  ;;  %v226_v6 = vadd.f32 %v857_v4, %v158_v59  ;;  %v227_v7 = vadd.f32 %v857_v4, %v159_v60  ;;  %v161_v8 = vmul.f32 %v852_v1, %v505_v61  ;;  %v775_v58 = vld [vmem:[%s1176_s0 + $0x70] sm:$0xff]  }
  0x11   :  { %v288_v9 = vmax.f32 %v224_v0, 0.0  ;;  %v289_v10 = vmax.f32 %v225_v2, 0.0  ;;  %v228_v11 = vadd.f32 %v857_v4, %v160_v3  ;;  %v508_v12 = vunpack.c.l.bf16 %v769_v62 }
  0x12   :  { %v625_v14 = vpack.c.bf16 %v287_v5, %v286_v63  ;;  %v290_v15 = vmax.f32 %v226_v6, 0.0  ;;  %v291_v16 = vmax.f32 %v227_v7, 0.0  ;;  %v229_v17 = vadd.f32 %v857_v4, %v161_v8  ;;  %v776_v63 = vld [vmem:[%s1176_s0 + $0x78] sm:$0xff]  }
  0x13   :  { %v630_v19 = vpack.c.bf16 %v289_v10, %v288_v9  ;;  %v292_v20 = vmax.f32 %v228_v11, 0.0  ;;  %v509_v21 = vunpack.c.h.bf16 %v769_v62  ;;  %v162_v22 = vmul.f32 %v852_v1, %v508_v12 }
  0x14   :  { %796 = vst [vmem:[%s1179_s3 + $0x20] sm:$0xff] %v625_v14   ;;  %v635_v24 = vpack.c.bf16 %v291_v16, %v290_v15  ;;  %v293_v25 = vmax.f32 %v229_v17, 0.0  ;;  %v512_v26 = vunpack.c.l.bf16 %v770_v13  ;;  %v513_v27 = vunpack.c.h.bf16 %v770_v13  ;;  %v777_v14 = vld [vmem:[%s1176_s0 + $0x80] sm:$0xff]  }
  0x15   :  { %797 = vst [vmem:[%s1179_s3 + $0x28] sm:$0xff] %v630_v19   ;;  %v163_v28 = vmul.f32 %v852_v1, %v509_v21  ;;  %v230_v29 = vadd.f32 %v857_v4, %v162_v22  ;;  %v516_v30 = vunpack.c.l.bf16 %v771_v18  ;;  %v517_v31 = vunpack.c.h.bf16 %v771_v18 }
  0x16   :  { %798 = vst [vmem:[%s1179_s3 + $0x30] sm:$0xff] %v635_v24   ;;  %v640_v32 = vpack.c.bf16 %v293_v25, %v292_v20  ;;  %v164_v33 = vmul.f32 %v852_v1, %v512_v26  ;;  %v165_v34 = vmul.f32 %v852_v1, %v513_v27  ;;  %v520_v35 = vunpack.c.l.bf16 %v772_v23  ;;  %v778_v27 = vld [vmem:[%s1176_s0 + $0x88] sm:$0xff]  }
  0x17   :  { %v231_v37 = vadd.f32 %v857_v4, %v163_v28  ;;  %v294_v38 = vmax.f32 %v230_v29, 0.0  ;;  %v166_v39 = vmul.f32 %v852_v1, %v516_v30  ;;  %v167_v40 = vmul.f32 %v852_v1, %v517_v31 }
  0x18   :  { %799 = vst [vmem:[%s1179_s3 + $0x38] sm:$0xff] %v640_v32   ;;  %v232_v41 = vadd.f32 %v857_v4, %v164_v33  ;;  %v233_v42 = vadd.f32 %v857_v4, %v165_v34  ;;  %v521_v43 = vunpack.c.h.bf16 %v772_v23  ;;  %v168_v44 = vmul.f32 %v852_v1, %v520_v35 }
  0x19   :  { %v295_v45 = vmax.f32 %v231_v37, 0.0  ;;  %v234_v46 = vadd.f32 %v857_v4, %v166_v39  ;;  %v235_v47 = vadd.f32 %v857_v4, %v167_v40  ;;  %v524_v48 = vunpack.c.l.bf16 %v773_v36 }
  0x1a   :  { %v296_v49 = vmax.f32 %v232_v41, 0.0  ;;  %v297_v50 = vmax.f32 %v233_v42, 0.0  ;;  %v169_v51 = vmul.f32 %v852_v1, %v521_v43  ;;  %v236_v52 = vadd.f32 %v857_v4, %v168_v44  ;;  %v780_v41 = vld [vmem:[%s1176_s0 + $0x98] sm:$0xff]  }
  0x1b   :  { %v645_v54 = vpack.c.bf16 %v295_v45, %v294_v38  ;;  %v298_v55 = vmax.f32 %v234_v46, 0.0  ;;  %v299_v56 = vmax.f32 %v235_v47, 0.0  ;;  %v525_v57 = vunpack.c.h.bf16 %v773_v36  ;;  %v779_v36 = vld [vmem:[%s1176_s0 + $0x90] sm:$0xff]  }
  0x1c   :  { %v650_v59 = vpack.c.bf16 %v297_v50, %v296_v49  ;;  %v237_v60 = vadd.f32 %v857_v4, %v169_v51  ;;  %v300_v61 = vmax.f32 %v236_v52, 0.0  ;;  %v170_v62 = vmul.f32 %v852_v1, %v524_v48 }
  0x1d   :  { %800 = vst [vmem:[%s1179_s3 + $0x40] sm:$0xff] %v645_v54   ;;  %v655_v0 = vpack.c.bf16 %v299_v56, %v298_v55  ;;  %v171_v2 = vmul.f32 %v852_v1, %v525_v57  ;;  %v528_v3 = vunpack.c.l.bf16 %v774_v53  ;;  %v529_v5 = vunpack.c.h.bf16 %v774_v53  ;;  %v781_v54 = vld [vmem:[%s1176_s0 + $0xa0] sm:$0xff]  }
  0x1e   :  { %801 = vst [vmem:[%s1179_s3 + $0x48] sm:$0xff] %v650_v59   ;;  %v301_v6 = vmax.f32 %v237_v60, 0.0  ;;  %v238_v7 = vadd.f32 %v857_v4, %v170_v62  ;;  %v532_v8 = vunpack.c.l.bf16 %v775_v58  ;;  %v533_v9 = vunpack.c.h.bf16 %v775_v58 }
  0x1f   :  { %802 = vst [vmem:[%s1179_s3 + $0x50] sm:$0xff] %v655_v0   ;;  %v239_v10 = vadd.f32 %v857_v4, %v171_v2  ;;  %v172_v11 = vmul.f32 %v852_v1, %v528_v3  ;;  %v173_v12 = vmul.f32 %v852_v1, %v529_v5  ;;  %v536_v13 = vunpack.c.l.bf16 %v776_v63  ;;  %v782_v5 = vld [vmem:[%s1176_s0 + $0xa8] sm:$0xff]  }
  0x20   :  { %v660_v15 = vpack.c.bf16 %v301_v6, %v300_v61  ;;  %v302_v16 = vmax.f32 %v238_v7, 0.0  ;;  %v174_v17 = vmul.f32 %v852_v1, %v532_v8  ;;  %v175_v18 = vmul.f32 %v852_v1, %v533_v9 }
  0x21   :  { %v303_v19 = vmax.f32 %v239_v10, 0.0  ;;  %v240_v20 = vadd.f32 %v857_v4, %v172_v11  ;;  %v241_v21 = vadd.f32 %v857_v4, %v173_v12  ;;  %v537_v22 = vunpack.c.h.bf16 %v776_v63 }
  0x22   :  { %803 = vst [vmem:[%s1179_s3 + $0x58] sm:$0xff] %v660_v15   ;;  %v242_v23 = vadd.f32 %v857_v4, %v174_v17  ;;  %v243_v24 = vadd.f32 %v857_v4, %v175_v18  ;;  %v176_v25 = vmul.f32 %v852_v1, %v536_v13  ;;  %v540_v26 = vunpack.c.l.bf16 %v777_v14 }
  0x23   :  { %v665_v28 = vpack.c.bf16 %v303_v19, %v302_v16  ;;  %v304_v29 = vmax.f32 %v240_v20, 0.0  ;;  %v305_v30 = vmax.f32 %v241_v21, 0.0  ;;  %v177_v31 = vmul.f32 %v852_v1, %v537_v22 }
  0x24   :  { %v306_v32 = vmax.f32 %v242_v23, 0.0  ;;  %v307_v33 = vmax.f32 %v243_v24, 0.0  ;;  %v244_v34 = vadd.f32 %v857_v4, %v176_v25  ;;  %v541_v35 = vunpack.c.h.bf16 %v777_v14  ;;  %v783_v14 = vld [vmem:[%s1176_s0 + $0xb0] sm:$0xff]   ;;  %v784_v23 = vld [vmem:[%s1176_s0 + $0xb8] sm:$0xff]  }
  0x25   :  { %804 = vst [vmem:[%s1179_s3 + $0x60] sm:$0xff] %v665_v28   ;;  %v670_v37 = vpack.c.bf16 %v305_v30, %v304_v29  ;;  %v245_v38 = vadd.f32 %v857_v4, %v177_v31  ;;  %v178_v39 = vmul.f32 %v852_v1, %v540_v26  ;;  %v544_v40 = vunpack.c.l.bf16 %v778_v27 }
  0x26   :  { %v675_v42 = vpack.c.bf16 %v307_v33, %v306_v32  ;;  %v308_v43 = vmax.f32 %v244_v34, 0.0  ;;  %v179_v44 = vmul.f32 %v852_v1, %v541_v35  ;;  %v545_v45 = vunpack.c.h.bf16 %v778_v27  ;;  %v785_v32 = vld [vmem:[%s1176_s0 + $0xc0] sm:$0xff]  }
  0x27   :  { %805 = vst [vmem:[%s1179_s3 + $0x68] sm:$0xff] %v670_v37   ;;  %v309_v46 = vmax.f32 %v245_v38, 0.0  ;;  %v246_v47 = vadd.f32 %v857_v4, %v178_v39  ;;  %v180_v48 = vmul.f32 %v852_v1, %v544_v40  ;;  %v548_v49 = vunpack.c.l.bf16 %v779_v36 }
  0x28   :  { %806 = vst [vmem:[%s1179_s3 + $0x70] sm:$0xff] %v675_v42   ;;  %v247_v50 = vadd.f32 %v857_v4, %v179_v44  ;;  %v181_v51 = vmul.f32 %v852_v1, %v545_v45  ;;  %v549_v52 = vunpack.c.h.bf16 %v779_v36  ;;  %v552_v53 = vunpack.c.l.bf16 %v780_v41  ;;  %v786_v45 = vld [vmem:[%s1176_s0 + $0xc8] sm:$0xff]  }
  0x29   :  { %v680_v55 = vpack.c.bf16 %v309_v46, %v308_v43  ;;  %v310_v56 = vmax.f32 %v246_v47, 0.0  ;;  %v248_v57 = vadd.f32 %v857_v4, %v180_v48  ;;  %v182_v58 = vmul.f32 %v852_v1, %v548_v49 }
  0x2a   :  { %v311_v59 = vmax.f32 %v247_v50, 0.0  ;;  %v249_v60 = vadd.f32 %v857_v4, %v181_v51  ;;  %v183_v61 = vmul.f32 %v852_v1, %v549_v52  ;;  %v553_v62 = vunpack.c.h.bf16 %v780_v41 }
  0x2b   :  { %807 = vst [vmem:[%s1179_s3 + $0x78] sm:$0xff] %v680_v55   ;;  %v312_v63 = vmax.f32 %v248_v57, 0.0  ;;  %v250_v0 = vadd.f32 %v857_v4, %v182_v58  ;;  %v184_v2 = vmul.f32 %v852_v1, %v552_v53  ;;  %v556_v3 = vunpack.c.l.bf16 %v781_v54 }
  0x2c   :  { %v685_v6 = vpack.c.bf16 %v311_v59, %v310_v56  ;;  %v313_v7 = vmax.f32 %v249_v60, 0.0  ;;  %v251_v8 = vadd.f32 %v857_v4, %v183_v61  ;;  %v185_v9 = vmul.f32 %v852_v1, %v553_v62 }
  0x2d   :  { %v314_v10 = vmax.f32 %v250_v0, 0.0  ;;  %v252_v11 = vadd.f32 %v857_v4, %v184_v2  ;;  %v557_v12 = vunpack.c.h.bf16 %v781_v54  ;;  %v186_v13 = vmul.f32 %v852_v1, %v556_v3  ;;  %v787_v54 = vld [vmem:[%s1176_s0 + $0xd0] sm:$0xff]  }
  0x2e   :  { %808 = vst [vmem:[%s1179_s3 + $0x80] sm:$0xff] %v685_v6   ;;  %v690_v15 = vpack.c.bf16 %v313_v7, %v312_v63  ;;  %v315_v16 = vmax.f32 %v251_v8, 0.0  ;;  %v253_v17 = vadd.f32 %v857_v4, %v185_v9  ;;  %v560_v18 = vunpack.c.l.bf16 %v782_v5  ;;  %v788_v63 = vld [vmem:[%s1176_s0 + $0xd8] sm:$0xff]  }
  0x2f   :  { %v316_v19 = vmax.f32 %v252_v11, 0.0  ;;  %v187_v20 = vmul.f32 %v852_v1, %v557_v12  ;;  %v254_v21 = vadd.f32 %v857_v4, %v186_v13  ;;  %v561_v22 = vunpack.c.h.bf16 %v782_v5 }
  0x30   :  { %809 = vst [vmem:[%s1179_s3 + $0x88] sm:$0xff] %v690_v15   ;;  %v695_v24 = vpack.c.bf16 %v315_v16, %v314_v10  ;;  %v317_v25 = vmax.f32 %v253_v17, 0.0  ;;  %v188_v26 = vmul.f32 %v852_v1, %v560_v18  ;;  %v564_v27 = vunpack.c.l.bf16 %v783_v14  ;;  %v789_v10 = vld [vmem:[%s1176_s0 + $0xe0] sm:$0xff]  }
  0x31   :  { %v255_v28 = vadd.f32 %v857_v4, %v187_v20  ;;  %v318_v29 = vmax.f32 %v254_v21, 0.0  ;;  %v189_v30 = vmul.f32 %v852_v1, %v561_v22  ;;  %v565_v31 = vunpack.c.h.bf16 %v783_v14 }
  0x32   :  { %810 = vst [vmem:[%s1179_s3 + $0x90] sm:$0xff] %v695_v24   ;;  %v700_v33 = vpack.c.bf16 %v317_v25, %v316_v19  ;;  %v256_v34 = vadd.f32 %v857_v4, %v188_v26  ;;  %v190_v35 = vmul.f32 %v852_v1, %v564_v27  ;;  %v568_v36 = vunpack.c.l.bf16 %v784_v23 }
  0x33   :  { %v319_v37 = vmax.f32 %v255_v28, 0.0  ;;  %v257_v38 = vadd.f32 %v857_v4, %v189_v30  ;;  %v191_v39 = vmul.f32 %v852_v1, %v565_v31  ;;  %v569_v40 = vunpack.c.h.bf16 %v784_v23  ;;  %v790_v23 = vld [vmem:[%s1176_s0 + $0xe8] sm:$0xff]  }
  0x34   :  { %811 = vst [vmem:[%s1179_s3 + $0x98] sm:$0xff] %v700_v33   ;;  %v320_v41 = vmax.f32 %v256_v34, 0.0  ;;  %v258_v42 = vadd.f32 %v857_v4, %v190_v35  ;;  %v192_v43 = vmul.f32 %v852_v1, %v568_v36  ;;  %v572_v44 = vunpack.c.l.bf16 %v785_v32 }
  0x35   :  { %v705_v46 = vpack.c.bf16 %v319_v37, %v318_v29  ;;  %v321_v47 = vmax.f32 %v257_v38, 0.0  ;;  %v259_v48 = vadd.f32 %v857_v4, %v191_v39  ;;  %v193_v49 = vmul.f32 %v852_v1, %v569_v40 }
  0x36   :  { %v322_v50 = vmax.f32 %v258_v42, 0.0  ;;  %v260_v51 = vadd.f32 %v857_v4, %v192_v43  ;;  %v573_v52 = vunpack.c.h.bf16 %v785_v32  ;;  %v194_v53 = vmul.f32 %v852_v1, %v572_v44  ;;  %v791_v32 = vld [vmem:[%s1176_s0 + $0xf0] sm:$0xff]  }
  0x37   :  { %812 = vst [vmem:[%s1179_s3 + $0xa0] sm:$0xff] %v705_v46   ;;  %v710_v55 = vpack.c.bf16 %v321_v47, %v320_v41  ;;  %v323_v56 = vmax.f32 %v259_v48, 0.0  ;;  %v261_v57 = vadd.f32 %v857_v4, %v193_v49  ;;  %v576_v58 = vunpack.c.l.bf16 %v786_v45  ;;  %v792_v41 = vld [vmem:[%s1176_s0 + $0xf8] sm:$0xff]  }
  0x38   :  { %v324_v59 = vmax.f32 %v260_v51, 0.0  ;;  %v195_v60 = vmul.f32 %v852_v1, %v573_v52  ;;  %v262_v61 = vadd.f32 %v857_v4, %v194_v53  ;;  %v577_v62 = vunpack.c.h.bf16 %v786_v45 }
  0x39   :  { %813 = vst [vmem:[%s1179_s3 + $0xa8] sm:$0xff] %v710_v55   ;;  %v715_v0 = vpack.c.bf16 %v323_v56, %v322_v50  ;;  %v325_v2 = vmax.f32 %v261_v57, 0.0  ;;  %v196_v3 = vmul.f32 %v852_v1, %v576_v58  ;;  %v580_v5 = vunpack.c.l.bf16 %v787_v54 }
  0x3a   :  { %v263_v6 = vadd.f32 %v857_v4, %v195_v60  ;;  %v326_v7 = vmax.f32 %v262_v61, 0.0  ;;  %v197_v8 = vmul.f32 %v852_v1, %v577_v62  ;;  %v581_v9 = vunpack.c.h.bf16 %v787_v54 }
  0x3b   :  { %814 = vst [vmem:[%s1179_s3 + $0xb0] sm:$0xff] %v715_v0   ;;  %v720_v11 = vpack.c.bf16 %v325_v2, %v324_v59  ;;  %v264_v12 = vadd.f32 %v857_v4, %v196_v3  ;;  %v198_v13 = vmul.f32 %v852_v1, %v580_v5  ;;  %v584_v14 = vunpack.c.l.bf16 %v788_v63 }
  0x3c   :  { %v327_v15 = vmax.f32 %v263_v6, 0.0  ;;  %v265_v16 = vadd.f32 %v857_v4, %v197_v8  ;;  %v199_v17 = vmul.f32 %v852_v1, %v581_v9  ;;  %v585_v18 = vunpack.c.h.bf16 %v788_v63 }
  0x3d   :  { %815 = vst [vmem:[%s1179_s3 + $0xb8] sm:$0xff] %v720_v11   ;;  %v328_v19 = vmax.f32 %v264_v12, 0.0  ;;  %v266_v20 = vadd.f32 %v857_v4, %v198_v13  ;;  %v200_v21 = vmul.f32 %v852_v1, %v584_v14  ;;  %v588_v22 = vunpack.c.l.bf16 %v789_v10 }
  0x3e   :  { %v725_v24 = vpack.c.bf16 %v327_v15, %v326_v7  ;;  %v329_v25 = vmax.f32 %v265_v16, 0.0  ;;  %v267_v26 = vadd.f32 %v857_v4, %v199_v17  ;;  %v201_v27 = vmul.f32 %v852_v1, %v585_v18 }
  0x3f   :  { %v330_v28 = vmax.f32 %v266_v20, 0.0  ;;  %v268_v29 = vadd.f32 %v857_v4, %v200_v21  ;;  %v589_v30 = vunpack.c.h.bf16 %v789_v10  ;;  %v202_v31 = vmul.f32 %v852_v1, %v588_v22 }
  0x40   :  { %816 = vst [vmem:[%s1179_s3 + $0xc0] sm:$0xff] %v725_v24   ;;  %v730_v33 = vpack.c.bf16 %v329_v25, %v328_v19  ;;  %v331_v34 = vmax.f32 %v267_v26, 0.0  ;;  %v269_v35 = vadd.f32 %v857_v4, %v201_v27  ;;  %v592_v36 = vunpack.c.l.bf16 %v790_v23 }
  0x41   :  { %v332_v37 = vmax.f32 %v268_v29, 0.0  ;;  %v203_v38 = vmul.f32 %v852_v1, %v589_v30  ;;  %v270_v39 = vadd.f32 %v857_v4, %v202_v31  ;;  %v593_v40 = vunpack.c.h.bf16 %v790_v23 }
  0x42   :  { %817 = vst [vmem:[%s1179_s3 + $0xc8] sm:$0xff] %v730_v33   ;;  %v735_v42 = vpack.c.bf16 %v331_v34, %v330_v28  ;;  %v333_v43 = vmax.f32 %v269_v35, 0.0  ;;  %v204_v44 = vmul.f32 %v852_v1, %v592_v36  ;;  %v596_v45 = vunpack.c.l.bf16 %v791_v32 }
  0x43   :  { %v271_v46 = vadd.f32 %v857_v4, %v203_v38  ;;  %v334_v47 = vmax.f32 %v270_v39, 0.0  ;;  %v205_v48 = vmul.f32 %v852_v1, %v593_v40  ;;  %v597_v49 = vunpack.c.h.bf16 %v791_v32 }
  0x44   :  { %818 = vst [vmem:[%s1179_s3 + $0xd0] sm:$0xff] %v735_v42   ;;  %v740_v50 = vpack.c.bf16 %v333_v43, %v332_v37  ;;  %v272_v51 = vadd.f32 %v857_v4, %v204_v44  ;;  %v206_v52 = vmul.f32 %v852_v1, %v596_v45  ;;  %v600_v53 = vunpack.c.l.bf16 %v792_v41 }
  0x45   :  { %v335_v54 = vmax.f32 %v271_v46, 0.0  ;;  %v273_v55 = vadd.f32 %v857_v4, %v205_v48  ;;  %v207_v56 = vmul.f32 %v852_v1, %v597_v49  ;;  %v601_v57 = vunpack.c.h.bf16 %v792_v41 }
  0x46   :  { %819 = vst [vmem:[%s1179_s3 + $0xd8] sm:$0xff] %v740_v50   ;;  %v336_v58 = vmax.f32 %v272_v51, 0.0  ;;  %v274_v59 = vadd.f32 %v857_v4, %v206_v52  ;;  %v208_v60 = vmul.f32 %v852_v1, %v600_v53 }
  0x47   :  { %v745_v61 = vpack.c.bf16 %v335_v54, %v334_v47  ;;  %v337_v62 = vmax.f32 %v273_v55, 0.0  ;;  %v275_v63 = vadd.f32 %v857_v4, %v207_v56  ;;  %v209_v0 = vmul.f32 %v852_v1, %v601_v57 }
  0x48   :  { %v338_v2 = vmax.f32 %v274_v59, 0.0  ;;  %v276_v3 = vadd.f32 %v857_v4, %v208_v60 }
  0x49   :  { %820 = vst [vmem:[%s1179_s3 + $0xe0] sm:$0xff] %v745_v61   ;;  %v750_v5 = vpack.c.bf16 %v337_v62, %v336_v58  ;;  %v339_v6 = vmax.f32 %v275_v63, 0.0  ;;  %v277_v7 = vadd.f32 %v857_v4, %v209_v0 }
  0x4a   :  { %v340_v8 = vmax.f32 %v276_v3, 0.0 }
  0x4b   :  { %821 = vst [vmem:[%s1179_s3 + $0xe8] sm:$0xff] %v750_v5   ;;  %v755_v9 = vpack.c.bf16 %v339_v6, %v338_v2  ;;  %v341_v10 = vmax.f32 %v277_v7, 0.0 }
  0x4d   :  { %822 = vst [vmem:[%s1179_s3 + $0xf0] sm:$0xff] %v755_v9   ;;  %v760_v1 = vpack.c.bf16 %v341_v10, %v340_v8 }
  0x4f   :  { %823 = vst [vmem:[%s1179_s3 + $0xf8] sm:$0xff] %v760_v1  }

// kernel: conv_bn_relu.2
= control target key start
LH: loop header
LB: loop body
LE: loop exit
PB: predicated region body
PF: predicated region fallthrough
CT: control target
= control target key end

     0   :  { %s2116_s1 = inlined_call_operand.vmem [shape: bf16[128,128], index: 1, kind: input, shape index: {}]   ;;  %s2117_s0 = inlined_call_operand.vmem [shape: bf16[512,128], index: 0, kind: input, shape index: {}]   ;;  %s2118_s2 = inlined_call_operand.vmem [shape: bf16[512,128], index: 2, kind: output, shape index: {0}]   ;;  %s2119_s3 = inlined_call_operand.vmem [shape: f32[1,8,128], index: 3, kind: output, shape index: {1}]  }
   0x1   :  { %v1373_v0 = vld [vmem:[%s2116_s1 + $0x38] sm:$0xff]  ;;  %v1372_v1 = vld [vmem:[%s2116_s1 + $0x30] sm:$0xff]  ;;  %v1371_v2 = vld [vmem:[%s2116_s1 + $0x28] sm:$0xff] }
   0x2   :  { %465 = vmatpush.bf16.msra.mxu0 %v1373_v0  ;;  %1565 = vmatpush.bf16.msra.mxu1 %v1373_v0  ;;  %v1370_v3 = vld [vmem:[%s2116_s1 + $0x20] sm:$0xff]  ;;  %v1369_v4 = vld [vmem:[%s2116_s1 + $0x18] sm:$0xff]  ;;  %v1368_v5 = vld [vmem:[%s2116_s1 + $0x10] sm:$0xff] }
   0x3   :  { %1566 = vmatpush.bf16.msra.mxu2 %v1373_v0  ;;  %1567 = vmatpush.bf16.msra.mxu3 %v1373_v0  ;;  %v1367_v6 = vld [vmem:[%s2116_s1 + $0x8] sm:$0xff]  ;;  %v1366_v7 = vld [vmem:[%s2116_s1] sm:$0xff]  ;;  %v1336_v13 = vld [vmem:[%s2117_s0 + $0x10] sm:$0xff] }
   0x4   :  { %v1334_v8 = vld [vmem:[%s2117_s0] sm:$0xff]  ;;  %v1335_v10 = vld [vmem:[%s2117_s0 + $0x8] sm:$0xff]  ;;  %v1344_v14 = vld [vmem:[%s2117_s0 + $0x50] sm:$0xff] }
   0x5   :  { %v1342_v9 = vld [vmem:[%s2117_s0 + $0x40] sm:$0xff]  ;;  %v1343_v11 = vld [vmem:[%s2117_s0 + $0x48] sm:$0xff]  ;;  %v1337_v16 = vld [vmem:[%s2117_s0 + $0x18] sm:$0xff] }
   0x6   :  { %466 = vmatpush.bf16.msra.mxu0 %v1372_v1  ;;  %1568 = vmatpush.bf16.msra.mxu1 %v1372_v1  ;;  %v1350_v12 = vld [vmem:[%s2117_s0 + $0x80] sm:$0xff]  ;;  %v1351_v15 = vld [vmem:[%s2117_s0 + $0x88] sm:$0xff]  ;;  %v1345_v17 = vld [vmem:[%s2117_s0 + $0x58] sm:$0xff] }
   0x7   :  { %1569 = vmatpush.bf16.msra.mxu2 %v1372_v1  ;;  %1570 = vmatpush.bf16.msra.mxu3 %v1372_v1  ;;  %v1352_v18 = vld [vmem:[%s2117_s0 + $0x90] sm:$0xff]  ;;  %v1358_v19 = vld [vmem:[%s2117_s0 + $0xc0] sm:$0xff]  ;;  %v1353_v22 = vld [vmem:[%s2117_s0 + $0x98] sm:$0xff] }
   0x8   :  { %v1338_v20 = vld [vmem:[%s2117_s0 + $0x20] sm:$0xff]  ;;  %v1359_v23 = vld [vmem:[%s2117_s0 + $0xc8] sm:$0xff]  ;;  %v1360_v27 = vld [vmem:[%s2117_s0 + $0xd0] sm:$0xff] }
   0x9   :  { %v1346_v21 = vld [vmem:[%s2117_s0 + $0x60] sm:$0xff]  ;;  %v1339_v24 = vld [vmem:[%s2117_s0 + $0x28] sm:$0xff]  ;;  %v1340_v28 = vld [vmem:[%s2117_s0 + $0x30] sm:$0xff] }
   0xa   :  { %467 = vmatpush.bf16.msra.mxu0 %v1371_v2  ;;  %1571 = vmatpush.bf16.msra.mxu1 %v1371_v2  ;;  %v1347_v25 = vld [vmem:[%s2117_s0 + $0x68] sm:$0xff]  ;;  %v1354_v26 = vld [vmem:[%s2117_s0 + $0xa0] sm:$0xff]  ;;  %v1348_v29 = vld [vmem:[%s2117_s0 + $0x70] sm:$0xff] }
   0xb   :  { %1572 = vmatpush.bf16.msra.mxu2 %v1371_v2  ;;  %1573 = vmatpush.bf16.msra.mxu3 %v1371_v2  ;;  %v1355_v30 = vld [vmem:[%s2117_s0 + $0xa8] sm:$0xff]  ;;  %v1361_v31 = vld [vmem:[%s2117_s0 + $0xd8] sm:$0xff]  ;;  %v1356_v34 = vld [vmem:[%s2117_s0 + $0xb0] sm:$0xff] }
   0xc   :  { %v1341_v32 = vld [vmem:[%s2117_s0 + $0x38] sm:$0xff]  ;;  %v1362_v35 = vld [vmem:[%s2117_s0 + $0xe0] sm:$0xff]  ;;  %v1363_v39 = vld [vmem:[%s2117_s0 + $0xe8] sm:$0xff] }
   0xd   :  { %v1349_v33 = vld [vmem:[%s2117_s0 + $0x78] sm:$0xff]  ;;  %v1364_v53 = vld [vmem:[%s2117_s0 + $0xf0] sm:$0xff] }
   0xe   :  { %468 = vmatpush.bf16.msra.mxu0 %v1370_v3  ;;  %1574 = vmatpush.bf16.msra.mxu1 %v1370_v3  ;;  %v1357_v38 = vld [vmem:[%s2117_s0 + $0xb8] sm:$0xff] }
   0xf   :  { %1575 = vmatpush.bf16.msra.mxu2 %v1370_v3  ;;  %1576 = vmatpush.bf16.msra.mxu3 %v1370_v3 }
  0x12   :  { %469 = vmatpush.bf16.msra.mxu0 %v1369_v4  ;;  %1577 = vmatpush.bf16.msra.mxu1 %v1369_v4 }
  0x13   :  { %1578 = vmatpush.bf16.msra.mxu2 %v1369_v4  ;;  %1579 = vmatpush.bf16.msra.mxu3 %v1369_v4 }
  0x16   :  { %470 = vmatpush.bf16.msra.mxu0 %v1368_v5  ;;  %1580 = vmatpush.bf16.msra.mxu1 %v1368_v5 }
  0x17   :  { %1581 = vmatpush.bf16.msra.mxu2 %v1368_v5  ;;  %1582 = vmatpush.bf16.msra.mxu3 %v1368_v5  ;;  %v1365_v5 = vld [vmem:[%s2117_s0 + $0xf8] sm:$0xff] }
  0x1a   :  { %471 = vmatpush.bf16.msra.mxu0 %v1367_v6  ;;  %1583 = vmatpush.bf16.msra.mxu1 %v1367_v6 }
  0x1b   :  { %1584 = vmatpush.bf16.msra.mxu2 %v1367_v6  ;;  %1585 = vmatpush.bf16.msra.mxu3 %v1367_v6 }
  0x1e   :  { %472 = vmatpush.bf16.msra.mxu0 %v1366_v7  ;;  %1586 = vmatpush.bf16.msra.mxu1 %v1366_v7 }
  0x1f   :  { %1587 = vmatpush.bf16.msra.mxu2 %v1366_v7  ;;  %1588 = vmatpush.bf16.msra.mxu3 %v1366_v7 }
  0x21   :  { %473 = vmatmul.bf16.vlgmr.msra.gmra.mxu0 %v1334_v8  ;;  %513 = vmatmul.bf16.vlgmr.msra.gmra.mxu1 %v1342_v9 }
  0x22   :  { %553 = vmatmul.bf16.vlgmr.msra.gmra.mxu2 %v1350_v12  ;;  %593 = vmatmul.bf16.vlgmr.msra.gmra.mxu3 %v1358_v19 }
  0x31   :  { %478 = vmatmul.bf16.gmra.mxu0 %v1335_v10  ;;  %518 = vmatmul.bf16.gmra.mxu1 %v1343_v11 }
  0x32   :  { %558 = vmatmul.bf16.gmra.mxu2 %v1351_v15  ;;  %598 = vmatmul.bf16.gmra.mxu3 %v1359_v23 }
  0x41   :  { %483 = vmatmul.bf16.gmra.mxu0 %v1336_v13  ;;  %523 = vmatmul.bf16.gmra.mxu1 %v1344_v14 }
  0x42   :  { %563 = vmatmul.bf16.gmra.mxu2 %v1352_v18  ;;  %603 = vmatmul.bf16.gmra.mxu3 %v1360_v27 }
  0x51   :  { %488 = vmatmul.bf16.gmra.mxu0 %v1337_v16  ;;  %528 = vmatmul.bf16.gmra.mxu1 %v1345_v17 }
  0x52   :  { %568 = vmatmul.bf16.gmra.mxu2 %v1353_v22  ;;  %608 = vmatmul.bf16.gmra.mxu3 %v1361_v31 }
  0x61   :  { %493 = vmatmul.bf16.gmra.mxu0 %v1338_v20  ;;  %533 = vmatmul.bf16.gmra.mxu1 %v1346_v21 }
  0x62   :  { %573 = vmatmul.bf16.gmra.mxu2 %v1354_v26  ;;  %613 = vmatmul.bf16.gmra.mxu3 %v1362_v35 }
  0x71   :  { %498 = vmatmul.bf16.gmra.mxu0 %v1339_v24  ;;  %538 = vmatmul.bf16.gmra.mxu1 %v1347_v25 }
  0x72   :  { %578 = vmatmul.bf16.gmra.mxu2 %v1355_v30  ;;  %618 = vmatmul.bf16.gmra.mxu3 %v1363_v39 }
  0x81   :  { %503 = vmatmul.bf16.gmra.mxu0 %v1340_v28  ;;  %543 = vmatmul.bf16.gmra.mxu1 %v1348_v29 }
  0x82   :  { %583 = vmatmul.bf16.gmra.mxu2 %v1356_v34  ;;  %623 = vmatmul.bf16.gmra.mxu3 %v1364_v53 }
  0x91   :  { %508 = vmatmul.bf16.gmra.mxu0 %v1341_v32  ;;  %548 = vmatmul.bf16.gmra.mxu1 %v1349_v33 }
  0x92   :  { %588 = vmatmul.bf16.gmra.mxu2 %v1357_v38  ;;  %628 = vmatmul.bf16.gmra.mxu3 %v1365_v5 }
  0x9e   :  { %v474_v36 = vpop.f32.mrf.mxu0  ;;  %v1717_v37 = vpop.f32.mrf.mxu1 }
  0x9f   :  { %v1026_v40 = vmul.f32 %v474_v36, %v474_v36 }
  0xa5   :  { %v1744_v60 = vpop.f32.mrf.mxu2  ;;  %v1795_v20 = vpop.f32.mrf.mxu3 }
  0xa6   :  { %v476_v41 = vpop.f32.mrf.mxu0  ;;  %v1725_v42 = vpop.f32.mrf.mxu1 }
  0xa7   :  { %v1377_v43 = vpack.c.bf16 %v476_v41, %v474_v36  ;;  %v957_v44 = vadd.f32 %v476_v41, %v474_v36  ;;  %v1027_v45 = vmul.f32 %v476_v41, %v476_v41  ;;  %v1417_v46 = vpack.c.bf16 %v1725_v42, %v1717_v37 }
  0xa9   :  { %1378 = vst [vmem:[%s2118_s2] sm:$0xff] %v1377_v43   ;;  %v1090_v47 = vadd.f32 %v1027_v45, %v1026_v40 }
  0xaa   :  { %1541 = vst [vmem:[%s2118_s2 + $0x40] sm:$0xff] %v1417_v46  }
  0xad   :  { %v1756_v2 = vpop.f32.mrf.mxu2  ;;  %v1807_v24 = vpop.f32.mrf.mxu3 }
  0xae   :  { %v479_v48 = vpop.f32.mrf.mxu0  ;;  %v1735_v49 = vpop.f32.mrf.mxu1  ;;  %v1457_v3 = vpack.c.bf16 %v1756_v2, %v1744_v60  ;;  %v1497_v26 = vpack.c.bf16 %v1807_v24, %v1795_v20 }
  0xaf   :  { %v958_v50 = vadd.f32 %v957_v44, %v479_v48  ;;  %v1028_v51 = vmul.f32 %v479_v48, %v479_v48 }
  0xb0   :  { %1549 = vst [vmem:[%s2118_s2 + $0x80] sm:$0xff] %v1457_v3  }
  0xb1   :  { %v1091_v52 = vadd.f32 %v1090_v47, %v1028_v51  ;;  %1557 = vst [vmem:[%s2118_s2 + $0xc0] sm:$0xff] %v1497_v26  }
  0xb5   :  { %v1772_v10 = vpop.f32.mrf.mxu2  ;;  %v1825_v32 = vpop.f32.mrf.mxu3 }
  0xb6   :  { %v481_v54 = vpop.f32.mrf.mxu0  ;;  %v1740_v55 = vpop.f32.mrf.mxu1 }
  0xb7   :  { %v1382_v56 = vpack.c.bf16 %v481_v54, %v479_v48  ;;  %v959_v57 = vadd.f32 %v958_v50, %v481_v54  ;;  %v1029_v58 = vmul.f32 %v481_v54, %v481_v54  ;;  %v1422_v59 = vpack.c.bf16 %v1740_v55, %v1735_v49 }
  0xb9   :  { %1534 = vst [vmem:[%s2118_s2 + $0x8] sm:$0xff] %v1382_v56   ;;  %v1092_v61 = vadd.f32 %v1091_v52, %v1029_v58 }
  0xba   :  { %1542 = vst [vmem:[%s2118_s2 + $0x48] sm:$0xff] %v1422_v59  }
  0xbd   :  { %v1782_v13 = vpop.f32.mrf.mxu2  ;;  %v1837_v36 = vpop.f32.mrf.mxu3 }
  0xbe   :  { %v484_v62 = vpop.f32.mrf.mxu0  ;;  %v1752_v63 = vpop.f32.mrf.mxu1  ;;  %v1462_v14 = vpack.c.bf16 %v1782_v13, %v1772_v10  ;;  %v1502_v39 = vpack.c.bf16 %v1837_v36, %v1825_v32 }
  0xbf   :  { %v1754_v0 = vadd.f32 %v959_v57, %v484_v62  ;;  %v1030_v1 = vmul.f32 %v484_v62, %v484_v62 }
  0xc0   :  { %1550 = vst [vmem:[%s2118_s2 + $0x88] sm:$0xff] %v1462_v14  }
  0xc1   :  { %v1760_v4 = vadd.f32 %v1092_v61, %v1030_v1  ;;  %1558 = vst [vmem:[%s2118_s2 + $0xc8] sm:$0xff] %v1502_v39  }
  0xc5   :  { %v1793_v19 = vpop.f32.mrf.mxu2  ;;  %v1855_v46 = vpop.f32.mrf.mxu3 }
  0xc6   :  { %v486_v6 = vpop.f32.mrf.mxu0  ;;  %v1768_v7 = vpop.f32.mrf.mxu1 }
  0xc7   :  { %v1387_v8 = vpack.c.bf16 %v486_v6, %v484_v62  ;;  %v1427_v9 = vpack.c.bf16 %v1768_v7, %v1752_v63  ;;  %v1031_v52 = vmul.f32 %v486_v6, %v486_v6  ;;  %v961_v57 = vadd.f32 %v1754_v0, %v486_v6 }
  0xc9   :  { %1535 = vst [vmem:[%s2118_s2 + $0x10] sm:$0xff] %v1387_v8   ;;  %v1094_v58 = vadd.f32 %v1760_v4, %v1031_v52 }
  0xca   :  { %1543 = vst [vmem:[%s2118_s2 + $0x50] sm:$0xff] %v1427_v9  }
  0xcd   :  { %v1805_v23 = vpop.f32.mrf.mxu2  ;;  %v1867_v51 = vpop.f32.mrf.mxu3 }
  0xce   :  { %v489_v11 = vpop.f32.mrf.mxu0  ;;  %v1780_v12 = vpop.f32.mrf.mxu1  ;;  %v1467_v25 = vpack.c.bf16 %v1805_v23, %v1793_v19  ;;  %v1507_v54 = vpack.c.bf16 %v1867_v51, %v1855_v46 }
  0xcf   :  { %v1032_v56 = vmul.f32 %v489_v11, %v489_v11  ;;  %v962_v61 = vadd.f32 %v961_v57, %v489_v11 }
  0xd0   :  { %1551 = vst [vmem:[%s2118_s2 + $0x90] sm:$0xff] %v1467_v25  }
  0xd1   :  { %1559 = vst [vmem:[%s2118_s2 + $0xd0] sm:$0xff] %v1507_v54   ;;  %v1095_v62 = vadd.f32 %v1094_v58, %v1032_v56 }
  0xd5   :  { %v1823_v31 = vpop.f32.mrf.mxu2  ;;  %v1887_v0 = vpop.f32.mrf.mxu3 }
  0xd6   :  { %v491_v15 = vpop.f32.mrf.mxu0  ;;  %v1789_v16 = vpop.f32.mrf.mxu1 }
  0xd7   :  { %v1392_v17 = vpack.c.bf16 %v491_v15, %v489_v11  ;;  %v1432_v18 = vpack.c.bf16 %v1789_v16, %v1780_v12  ;;  %v1033_v59 = vmul.f32 %v491_v15, %v491_v15  ;;  %v963_v8 = vadd.f32 %v962_v61, %v491_v15 }
  0xd9   :  { %1536 = vst [vmem:[%s2118_s2 + $0x18] sm:$0xff] %v1392_v17   ;;  %v1096_v6 = vadd.f32 %v1095_v62, %v1033_v59 }
  0xda   :  { %1544 = vst [vmem:[%s2118_s2 + $0x58] sm:$0xff] %v1432_v18  }
  0xdd   :  { %v1835_v35 = vpop.f32.mrf.mxu2 }
  0xde   :  { %v494_v21 = vpop.f32.mrf.mxu0  ;;  %v1803_v22 = vpop.f32.mrf.mxu1  ;;  %v1472_v38 = vpack.c.bf16 %v1835_v35, %v1823_v31 }
  0xdf   :  { %v1034_v1 = vmul.f32 %v494_v21, %v494_v21  ;;  %v964_v25 = vadd.f32 %v963_v8, %v494_v21 }
  0xe0   :  { %1552 = vst [vmem:[%s2118_s2 + $0x98] sm:$0xff] %v1472_v38  }
  0xe1   :  { %v1097_v4 = vadd.f32 %v1096_v6, %v1034_v1 }
  0xe5   :  { %v1853_v45 = vpop.f32.mrf.mxu2 }
  0xe6   :  { %v496_v27 = vpop.f32.mrf.mxu0  ;;  %v1819_v28 = vpop.f32.mrf.mxu1 }
  0xe7   :  { %v1397_v29 = vpack.c.bf16 %v496_v27, %v494_v21  ;;  %v1437_v30 = vpack.c.bf16 %v1819_v28, %v1803_v22  ;;  %v1035_v18 = vmul.f32 %v496_v27, %v496_v27  ;;  %v965_v15 = vadd.f32 %v964_v25, %v496_v27 }
  0xe9   :  { %1537 = vst [vmem:[%s2118_s2 + $0x20] sm:$0xff] %v1397_v29   ;;  %v1098_v26 = vadd.f32 %v1097_v4, %v1035_v18 }
  0xea   :  { %1545 = vst [vmem:[%s2118_s2 + $0x60] sm:$0xff] %v1437_v30  }
  0xed   :  { %v1865_v50 = vpop.f32.mrf.mxu2 }
  0xee   :  { %v499_v33 = vpop.f32.mrf.mxu0  ;;  %v1833_v34 = vpop.f32.mrf.mxu1  ;;  %v1477_v53 = vpack.c.bf16 %v1865_v50, %v1853_v45 }
  0xef   :  { %v1036_v11 = vmul.f32 %v499_v33, %v499_v33  ;;  %v966_v30 = vadd.f32 %v965_v15, %v499_v33 }
  0xf0   :  { %1553 = vst [vmem:[%s2118_s2 + $0xa0] sm:$0xff] %v1477_v53   ;;  %v1899_v53 = vpop.f32.mrf.mxu3 }
  0xf1   :  { %v1099_v38 = vadd.f32 %v1098_v26, %v1036_v11  ;;  %v1512_v27 = vpack.c.bf16 %v1899_v53, %v1887_v0  ;;  %v1043_v26 = vmul.f32 %v1725_v42, %v1725_v42 }
  0xf3   :  { %1560 = vst [vmem:[%s2118_s2 + $0xd8] sm:$0xff] %v1512_v27  }
  0xf5   :  { %v1885_v17 = vpop.f32.mrf.mxu2 }
  0xf6   :  { %v501_v40 = vpop.f32.mrf.mxu0  ;;  %v1849_v41 = vpop.f32.mrf.mxu1 }
  0xf7   :  { %v1402_v43 = vpack.c.bf16 %v501_v40, %v499_v33  ;;  %v1442_v44 = vpack.c.bf16 %v1849_v41, %v1833_v34  ;;  %v1037_v29 = vmul.f32 %v501_v40, %v501_v40  ;;  %v967_v21 = vadd.f32 %v966_v30, %v501_v40 }
  0xf8   :  { %v1917_v4 = vpop.f32.mrf.mxu3 }
  0xf9   :  { %1538 = vst [vmem:[%s2118_s2 + $0x28] sm:$0xff] %v1402_v43   ;;  %v1100_v54 = vadd.f32 %v1099_v38, %v1037_v29  ;;  %v1044_v38 = vmul.f32 %v1735_v49, %v1735_v49 }
  0xfa   :  { %1546 = vst [vmem:[%s2118_s2 + $0x68] sm:$0xff] %v1442_v44  }
  0xfd   :  { %v1897_v52 = vpop.f32.mrf.mxu2 }
  0xfe   :  { %v504_v47 = vpop.f32.mrf.mxu0  ;;  %v1863_v48 = vpop.f32.mrf.mxu1  ;;  %v1482_v57 = vpack.c.bf16 %v1897_v52, %v1885_v17 }
  0xff   :  { %v1038_v39 = vmul.f32 %v504_v47, %v504_v47  ;;  %v968_v58 = vadd.f32 %v967_v21, %v504_v47 }
 0x100   :  { %1554 = vst [vmem:[%s2118_s2 + $0xa8] sm:$0xff] %v1482_v57   ;;  %v1939_v57 = vpop.f32.mrf.mxu3 }
 0x101   :  { %v1101_v33 = vadd.f32 %v1100_v54, %v1038_v39  ;;  %v1517_v27 = vpack.c.bf16 %v1939_v57, %v1917_v4 }
 0x103   :  { %1561 = vst [vmem:[%s2118_s2 + $0xe0] sm:$0xff] %v1517_v27  }
 0x105   :  { %v1915_v25 = vpop.f32.mrf.mxu2 }
 0x106   :  { %v506_v3 = vpop.f32.mrf.mxu0  ;;  %v1881_v5 = vpop.f32.mrf.mxu1 }
 0x107   :  { %v1407_v9 = vpack.c.bf16 %v506_v3, %v504_v47  ;;  %v1447_v14 = vpack.c.bf16 %v1881_v5, %v1863_v48  ;;  %v1039_v56 = vmul.f32 %v506_v3, %v506_v3  ;;  %v969_v40 = vadd.f32 %v968_v58, %v506_v3 }
 0x108   :  { %v1042_v3 = vmul.f32 %v1717_v37, %v1717_v37  ;;  %v1055_v27 = vmul.f32 %v1881_v5, %v1881_v5 }
 0x109   :  { %1539 = vst [vmem:[%s2118_s2 + $0x30] sm:$0xff] %v1407_v9   ;;  %v1102_v61 = vadd.f32 %v1101_v33, %v1039_v56 }
 0x10a   :  { %1547 = vst [vmem:[%s2118_s2 + $0x70] sm:$0xff] %v1447_v14  }
 0x10d   :  { %v1937_v56 = vpop.f32.mrf.mxu2 }
 0x10e   :  { %v509_v43 = vpop.f32.mrf.mxu0  ;;  %v1895_v44 = vpop.f32.mrf.mxu1 }
 0x10f   :  { %v1040_v59 = vmul.f32 %v509_v43, %v509_v43  ;;  %v970_v62 = vadd.f32 %v969_v40, %v509_v43 }
 0x111   :  { %v1103_v1 = vadd.f32 %v1102_v61, %v1040_v59  ;;  %v1048_v61 = vmul.f32 %v1780_v12, %v1780_v12 }
 0x116   :  { %v511_v8 = vpop.f32.mrf.mxu0  ;;  %v1911_v9 = vpop.f32.mrf.mxu1 }
 0x117   :  { %v1412_v14 = vpack.c.bf16 %v511_v8, %v509_v43  ;;  %v971_v6 = vadd.f32 %v970_v62, %v511_v8  ;;  %v1041_v47 = vmul.f32 %v511_v8, %v511_v8  ;;  %v1452_v18 = vpack.c.bf16 %v1911_v9, %v1895_v44 }
 0x119   :  { %1540 = vst [vmem:[%s2118_s2 + $0x38] sm:$0xff] %v1412_v14   ;;  %v972_v11 = vadd.f32 %v971_v6, %v1717_v37  ;;  %v1104_v15 = vadd.f32 %v1103_v1, %v1041_v47  ;;  %v1045_v37 = vmul.f32 %v1740_v55, %v1740_v55  ;;  %v1049_v1 = vmul.f32 %v1789_v16, %v1789_v16  ;;  %v1963_v6 = vpop.f32.mrf.mxu2 }
 0x11a   :  { %1548 = vst [vmem:[%s2118_s2 + $0x78] sm:$0xff] %v1452_v18   ;;  %v1050_v47 = vmul.f32 %v1803_v22, %v1803_v22 }
 0x11b   :  { %v973_v29 = vadd.f32 %v972_v11, %v1725_v42  ;;  %v1105_v30 = vadd.f32 %v1104_v15, %v1042_v3  ;;  %v1487_v42 = vpack.c.bf16 %v1937_v56, %v1915_v25  ;;  %v1051_v11 = vmul.f32 %v1819_v28, %v1819_v28 }
 0x11d   :  { %v974_v39 = vadd.f32 %v973_v29, %v1735_v49  ;;  %v1106_v43 = vadd.f32 %v1105_v30, %v1043_v26  ;;  %v1046_v49 = vmul.f32 %v1752_v63, %v1752_v63  ;;  %1555 = vst [vmem:[%s2118_s2 + $0xb0] sm:$0xff] %v1487_v42   ;;  %v1053_v30 = vmul.f32 %v1849_v41, %v1849_v41 }
 0x11f   :  { %v975_v21 = vadd.f32 %v974_v39, %v1740_v55  ;;  %v1107_v54 = vadd.f32 %v1106_v43, %v1044_v38  ;;  %v1047_v55 = vmul.f32 %v1768_v7, %v1768_v7 }
 0x121   :  { %v976_v58 = vadd.f32 %v975_v21, %v1752_v63  ;;  %v1108_v33 = vadd.f32 %v1107_v54, %v1045_v37 }
 0x123   :  { %v977_v59 = vadd.f32 %v976_v58, %v1768_v7  ;;  %v1109_v40 = vadd.f32 %v1108_v33, %v1046_v49  ;;  %v1965_v7 = vpop.f32.mrf.mxu3 }
 0x125   :  { %v1110_v62 = vadd.f32 %v1109_v40, %v1047_v55  ;;  %v978_v63 = vadd.f32 %v977_v59, %v1780_v12  ;;  %v1057_v59 = vmul.f32 %v1911_v9, %v1911_v9 }
 0x127   :  { %v979_v8 = vadd.f32 %v978_v63, %v1789_v16  ;;  %v1111_v14 = vadd.f32 %v1110_v62, %v1048_v61  ;;  %v1052_v16 = vmul.f32 %v1833_v34, %v1833_v34  ;;  %v1059_v63 = vmul.f32 %v1756_v2, %v1756_v2 }
 0x129   :  { %v980_v18 = vadd.f32 %v979_v8, %v1803_v22  ;;  %v1112_v3 = vadd.f32 %v1111_v14, %v1049_v1  ;;  %v1979_v22 = vpop.f32.mrf.mxu2  ;;  %v1060_v8 = vmul.f32 %v1772_v10, %v1772_v10 }
 0x12b   :  { %v981_v12 = vadd.f32 %v980_v18, %v1819_v28  ;;  %v1113_v15 = vadd.f32 %v1112_v3, %v1050_v47  ;;  %v1981_v43 = vpop.f32.mrf.mxu3  ;;  %v1492_v28 = vpack.c.bf16 %v1979_v22, %v1963_v6  ;;  %v1061_v47 = vmul.f32 %v1782_v13, %v1782_v13 }
 0x12c   :  { %v1522_v37 = vpack.c.bf16 %v1981_v43, %v1965_v7 }
 0x12d   :  { %v982_v26 = vadd.f32 %v981_v12, %v1833_v34  ;;  %v1114_v29 = vadd.f32 %v1113_v15, %v1051_v11  ;;  %v1054_v34 = vmul.f32 %v1863_v48, %v1863_v48  ;;  %1556 = vst [vmem:[%s2118_s2 + $0xb8] sm:$0xff] %v1492_v28  }
 0x12e   :  { %1562 = vst [vmem:[%s2118_s2 + $0xe8] sm:$0xff] %v1522_v37   ;;  %v1066_v37 = vmul.f32 %v1853_v45, %v1853_v45 }
 0x12f   :  { %v983_v38 = vadd.f32 %v982_v26, %v1849_v41  ;;  %v1115_v39 = vadd.f32 %v1114_v29, %v1052_v16  ;;  %v1064_v26 = vmul.f32 %v1823_v31, %v1823_v31 }
 0x131   :  { %v984_v21 = vadd.f32 %v983_v38, %v1863_v48  ;;  %v1116_v54 = vadd.f32 %v1115_v39, %v1053_v30  ;;  %v1056_v48 = vmul.f32 %v1895_v44, %v1895_v44 }
 0x133   :  { %v1117_v41 = vadd.f32 %v1116_v54, %v1054_v34  ;;  %v985_v42 = vadd.f32 %v984_v21, %v1881_v5  ;;  %v2005_v40 = vpop.f32.mrf.mxu3  ;;  %v1058_v5 = vmul.f32 %v1744_v60, %v1744_v60  ;;  %v1067_v34 = vmul.f32 %v1865_v50, %v1865_v50 }
 0x135   :  { %v1118_v49 = vadd.f32 %v1117_v41, %v1055_v27  ;;  %v986_v58 = vadd.f32 %v985_v42, %v1895_v44  ;;  %v1068_v41 = vmul.f32 %v1885_v17, %v1885_v17 }
 0x137   :  { %v1119_v33 = vadd.f32 %v1118_v49, %v1056_v48  ;;  %v987_v55 = vadd.f32 %v986_v58, %v1911_v9  ;;  %v1069_v49 = vmul.f32 %v1897_v52, %v1897_v52 }
 0x139   :  { %v988_v61 = vadd.f32 %v987_v55, %v1744_v60  ;;  %v1120_v62 = vadd.f32 %v1119_v33, %v1057_v59 }
 0x13b   :  { %v989_v1 = vadd.f32 %v988_v61, %v1756_v2  ;;  %v1121_v44 = vadd.f32 %v1120_v62, %v1058_v5  ;;  %v2019_v60 = vpop.f32.mrf.mxu3  ;;  %v1062_v2 = vmul.f32 %v1793_v19, %v1793_v19  ;;  %v1072_v62 = vmul.f32 %v1963_v6, %v1963_v6 }
 0x13c   :  { %v1527_v11 = vpack.c.bf16 %v2019_v60, %v2005_v40 }
 0x13d   :  { %v990_v14 = vadd.f32 %v989_v1, %v1772_v10  ;;  %v1122_v9 = vadd.f32 %v1121_v44, %v1059_v63  ;;  %v1063_v10 = vmul.f32 %v1805_v23, %v1805_v23  ;;  %v1074_v44 = vmul.f32 %v1795_v20, %v1795_v20 }
 0x13e   :  { %1563 = vst [vmem:[%s2118_s2 + $0xf0] sm:$0xff] %v1527_v11  }
 0x13f   :  { %v991_v18 = vadd.f32 %v990_v14, %v1782_v13  ;;  %v1123_v3 = vadd.f32 %v1122_v9, %v1060_v8 }
 0x141   :  { %v992_v12 = vadd.f32 %v991_v18, %v1793_v19  ;;  %v1124_v15 = vadd.f32 %v1123_v3, %v1061_v47  ;;  %v1065_v19 = vmul.f32 %v1835_v35, %v1835_v35 }
 0x143   :  { %v993_v13 = vadd.f32 %v992_v12, %v1805_v23  ;;  %v1125_v16 = vadd.f32 %v1124_v15, %v1062_v2  ;;  %v2038_v28 = vpop.f32.mrf.mxu3 }
 0x145   :  { %v1126_v29 = vadd.f32 %v1125_v16, %v1063_v10  ;;  %v994_v30 = vadd.f32 %v993_v13, %v1823_v31 }
 0x147   :  { %v995_v38 = vadd.f32 %v994_v30, %v1835_v35  ;;  %v1127_v39 = vadd.f32 %v1126_v29, %v1064_v26 }
 0x149   :  { %v996_v23 = vadd.f32 %v995_v38, %v1853_v45  ;;  %v1128_v21 = vadd.f32 %v1127_v39, %v1065_v19 }
 0x14b   :  { %v997_v54 = vadd.f32 %v996_v23, %v1865_v50  ;;  %v1129_v31 = vadd.f32 %v1128_v21, %v1066_v37  ;;  %v631_v45 = vpop.f32.mrf.mxu3  ;;  %v1070_v50 = vmul.f32 %v1915_v25, %v1915_v25 }
 0x14c   :  { %v1532_v48 = vpack.c.bf16 %v631_v45, %v2038_v28 }
 0x14d   :  { %v998_v35 = vadd.f32 %v997_v54, %v1885_v17  ;;  %v1130_v42 = vadd.f32 %v1129_v31, %v1067_v34  ;;  %v1085_v34 = vmul.f32 %v1981_v43, %v1981_v43 }
 0x14e   :  { %1564 = vst [vmem:[%s2118_s2 + $0xf8] sm:$0xff] %v1532_v48   ;;  %v1089_v48 = vmul.f32 %v631_v45, %v631_v45 }
 0x14f   :  { %v999_v27 = vadd.f32 %v998_v35, %v1897_v52  ;;  %v1131_v58 = vadd.f32 %v1130_v42, %v1068_v41  ;;  %v1071_v52 = vmul.f32 %v1937_v56, %v1937_v56  ;;  %v1086_v41 = vmul.f32 %v2005_v40, %v2005_v40 }
 0x150   :  { %v1087_v42 = vmul.f32 %v2019_v60, %v2019_v60 }
 0x151   :  { %v1132_v33 = vadd.f32 %v1131_v58, %v1069_v49  ;;  %v1000_v55 = vadd.f32 %v999_v27, %v1915_v25  ;;  %v1073_v25 = vmul.f32 %v1979_v22, %v1979_v22  ;;  %v1088_v49 = vmul.f32 %v2038_v28, %v2038_v28 }
 0x153   :  { %v1133_v17 = vadd.f32 %v1132_v33, %v1070_v50  ;;  %v1001_v59 = vadd.f32 %v1000_v55, %v1937_v56  ;;  %v1075_v56 = vmul.f32 %v1807_v24, %v1807_v24 }
 0x155   :  { %v1134_v5 = vadd.f32 %v1133_v17, %v1071_v52  ;;  %v1002_v61 = vadd.f32 %v1001_v59, %v1963_v6  ;;  %v1076_v6 = vmul.f32 %v1825_v32, %v1825_v32 }
 0x157   :  { %v1135_v63 = vadd.f32 %v1134_v5, %v1072_v62  ;;  %v1003_v1 = vadd.f32 %v1002_v61, %v1979_v22  ;;  %v1077_v22 = vmul.f32 %v1837_v36, %v1837_v36 }
 0x159   :  { %v1004_v8 = vadd.f32 %v1003_v1, %v1795_v20  ;;  %v1136_v14 = vadd.f32 %v1135_v63, %v1073_v25  ;;  %v1078_v20 = vmul.f32 %v1855_v46, %v1855_v46 }
 0x15b   :  { %v1005_v9 = vadd.f32 %v1004_v8, %v1807_v24  ;;  %v1137_v47 = vadd.f32 %v1136_v14, %v1074_v44  ;;  %v1079_v24 = vmul.f32 %v1867_v51, %v1867_v51 }
 0x15d   :  { %v1006_v18 = vadd.f32 %v1005_v9, %v1825_v32  ;;  %v1138_v3 = vadd.f32 %v1137_v47, %v1075_v56  ;;  %v1080_v32 = vmul.f32 %v1887_v0, %v1887_v0 }
 0x15f   :  { %v1007_v11 = vadd.f32 %v1006_v18, %v1837_v36  ;;  %v1139_v2 = vadd.f32 %v1138_v3, %v1076_v6  ;;  %v1081_v36 = vmul.f32 %v1899_v53, %v1899_v53 }
 0x161   :  { %v1008_v12 = vadd.f32 %v1007_v11, %v1855_v46  ;;  %v1140_v15 = vadd.f32 %v1139_v2, %v1077_v22  ;;  %v1082_v46 = vmul.f32 %v1917_v4, %v1917_v4 }
 0x163   :  { %v1009_v10 = vadd.f32 %v1008_v12, %v1867_v51  ;;  %v1141_v13 = vadd.f32 %v1140_v15, %v1078_v20  ;;  %v1083_v51 = vmul.f32 %v1939_v57, %v1939_v57 }
 0x165   :  { %v1142_v16 = vadd.f32 %v1141_v13, %v1079_v24  ;;  %v1010_v26 = vadd.f32 %v1009_v10, %v1887_v0  ;;  %v1084_v0 = vmul.f32 %v1965_v7, %v1965_v7 }
 0x167   :  { %v1011_v29 = vadd.f32 %v1010_v26, %v1899_v53  ;;  %v1143_v30 = vadd.f32 %v1142_v16, %v1080_v32 }
 0x169   :  { %v1012_v19 = vadd.f32 %v1011_v29, %v1917_v4  ;;  %v1144_v38 = vadd.f32 %v1143_v30, %v1081_v36 }
 0x16b   :  { %v1013_v39 = vadd.f32 %v1012_v19, %v1939_v57  ;;  %v1145_v37 = vadd.f32 %v1144_v38, %v1082_v46 }
 0x16d   :  { %v1014_v23 = vadd.f32 %v1013_v39, %v1965_v7  ;;  %v1146_v21 = vadd.f32 %v1145_v37, %v1083_v51 }
 0x16f   :  { %v1015_v53 = vadd.f32 %v1014_v23, %v1981_v43  ;;  %v1147_v54 = vadd.f32 %v1146_v21, %v1084_v0 }
 0x171   :  { %v1148_v4 = vadd.f32 %v1147_v54, %v1085_v34  ;;  %v1016_v31 = vadd.f32 %v1015_v53, %v2005_v40  ;;  %v1159_v40 = vlaneseq }
 0x173   :  { %v1149_v57 = vadd.f32 %v1148_v4, %v1086_v41  ;;  %v1017_v35 = vadd.f32 %v1016_v31, %v2019_v60  ;;  %v1160_v62 = vshrl.u32 %v1159_v40, 7 }
 0x175   :  { %v1150_v7 = vadd.f32 %v1149_v57, %v1087_v42  ;;  %v1018_v27 = vadd.f32 %v1017_v35, %v2038_v28  ;;  %vm1162_vm0 = vcmp.eq.s32.totalorder %v1160_v62, 1  ;;  %vm1161_vm1 = vcmp.eq.s32.totalorder %v1160_v62, 0 }
 0x177   :  { %v1151_v43 = vadd.f32 %v1150_v7, %v1088_v49  ;;  %v1019_v58 = vadd.f32 %v1018_v27, %v631_v45 }
 0x179   :  { %v1020_v33 = vrot.slane %v1019_v58, 4  ;;  %v1152_v55 = vadd.f32 %v1151_v43, %v1089_v48 }
 0x17b   :  { %v1021_v50 = vadd.f32 %v1020_v33, %v1019_v58  ;;  %v1153_v17 = vrot.slane %v1152_v55, 4 }
 0x17d   :  { %v1022_v59 = vrot.slane %v1021_v50, 2  ;;  %v1154_v52 = vadd.f32 %v1153_v17, %v1152_v55 }
 0x17f   :  { %v1023_v5 = vadd.f32 %v1022_v59, %v1021_v50  ;;  %v1155_v61 = vrot.slane %v1154_v52, 2 }
 0x181   :  { %v1156_v60 = vadd.f32 %v1155_v61, %v1154_v52  ;;  %v1024_v63 = vrot.slane %v1023_v5, 1 }
 0x183   :  { %v1157_v1 = vrot.slane %v1156_v60, 1  ;;  %v1025_v28 = vadd.f32 %v1024_v63, %v1023_v5 }
 0x185   :  { %v1158_v25 = vadd.f32 %v1157_v1, %v1156_v60 }
 0x187   :  { %v1163_v44 = vsel %vm1162_vm0, %v1158_v25, 0.0 }
 0x188   :  { %v1164_v8 = vsel %vm1161_vm1, %v1025_v28, %v1163_v44 }
 0x189   :  { %1165 = vst [vmem:[%s2119_s3] sm:$0xff] %v1164_v8 }

</bundles_post_ra>
